<compile_context>
chip_gen: v5e
topology: v5e:2x2
jax: 0.10.0
libtpu: 0.0.40
codegen_flags: <defaults>
</compile_context>

<pallas_src>
import functools

import jax
import jax.numpy as jnp
from jax.experimental import pallas as pl
from jax.experimental.pallas import tpu as pltpu

LANE = 128  # vreg lane width; every hot feature dim is padded to this


# ------------------------------ Pallas kernels -------------------------------

def prologue_kernel(x_ref, w_ref, b_ref, h_ref, m_ref):
    """h0 = linear(x); m1 = h0 @ W_prop1 (stored bf16 for the aggregation)."""
    HP = h_ref.shape[1]
    h = (jnp.dot(x_ref[...], w_ref[:, 0:HP], preferred_element_type=jnp.float32)
         + b_ref[...])
    h_ref[...] = h
    m_ref[...] = jnp.dot(h, w_ref[:, HP:2 * HP],
                         preferred_element_type=jnp.float32).astype(m_ref.dtype)


def _gru_update(agg, h, w_ref, b_ref, hidden):
    """nn.GRUCell(agg, h), compact gate packing: r/z/n at lane offsets 0/H/2H."""
    HP = h.shape[1]
    gi = (jnp.dot(agg, w_ref[:, 0:HP], preferred_element_type=jnp.float32)
          + b_ref[:, 0:HP])
    gh = (jnp.dot(h, w_ref[:, HP:2 * HP], preferred_element_type=jnp.float32)
          + b_ref[:, HP:2 * HP])
    r = jax.nn.sigmoid(gi[:, 0:hidden] + gh[:, 0:hidden])
    z = jax.nn.sigmoid(gi[:, hidden:2 * hidden] + gh[:, hidden:2 * hidden])
    n = jnp.tanh(gi[:, 2 * hidden:3 * hidden] + r * gh[:, 2 * hidden:3 * hidden])
    return (1.0 - z) * n + z * h[:, 0:hidden]          # (TM, hidden)


def ggc_mid_kernel(a_ref, m_ref, h_ref, w_ref, b_ref, hout_ref, mout_ref,
                   acc_ref, *, hidden):
    """GatedGraphConv layer 1 + ELU, plus m2 for the next layer's aggregation."""
    k = pl.program_id(1)

    @pl.when(k == 0)
    def _():
        acc_ref[...] = jnp.zeros_like(acc_ref)

    # agg[i] += A[i, k] @ m[k]   (bf16 operands, f32 accumulate on the MXU)
    acc_ref[...] += jnp.dot(a_ref[...], m_ref[...],
                            preferred_element_type=jnp.float32)

    @pl.when(k == pl.num_programs(1) - 1)
    def _():
        HP = hout_ref.shape[1]
        TM = hout_ref.shape[0]
        h_new = _gru_update(acc_ref[...], h_ref[...], w_ref, b_ref, hidden)
        # F.elu (unselected expm1 branch clamped so it cannot overflow)
        h_new = jnp.where(h_new > 0.0, h_new, jnp.expm1(jnp.minimum(h_new, 0.0)))
        h_pad = jnp.concatenate(
            [h_new, jnp.zeros((TM, HP - hidden), jnp.float32)], axis=1)
        hout_ref[...] = h_pad                                     # lane-dense vst
        mout_ref[...] = jnp.dot(h_pad, w_ref[:, 2 * HP:3 * HP],
                                preferred_element_type=jnp.float32
                                ).astype(mout_ref.dtype)


def ggc_final_kernel(a_ref, m_ref, h_ref, y_ref, w_ref, b_ref,
                     feat_ref, logits_ref, nll_ref, acc_ref,
                     *, hidden, num_label):
    """GatedGraphConv layer 2 + classify + per-node cross entropy."""
    k = pl.program_id(1)

    @pl.when(k == 0)
    def _():
        acc_ref[...] = jnp.zeros_like(acc_ref)

    acc_ref[...] += jnp.dot(a_ref[...], m_ref[...],
                            preferred_element_type=jnp.float32)

    @pl.when(k == pl.num_programs(1) - 1)
    def _():
        HP = feat_ref.shape[1]
        LP = logits_ref.shape[1]
        TM = feat_ref.shape[0]
        h_new = _gru_update(acc_ref[...], h_ref[...], w_ref, b_ref, hidden)
        h_pad = jnp.concatenate(
            [h_new, jnp.zeros((TM, HP - hidden), jnp.float32)], axis=1)
        feat_ref[...] = h_pad                                     # features = x

        # output = self.classify(x)
        logits = (jnp.dot(h_pad, w_ref[:, 2 * HP:2 * HP + LP],
                          preferred_element_type=jnp.float32)
                  + b_ref[:, 2 * HP:2 * HP + LP])
        logits_ref[...] = logits

        # CrossEntropyLoss() is constructed WITHOUT class weights in forward(),
        # so the loss is an unweighted mean; per-node NLL emitted here, the mean
        # over the N real nodes is taken in the wrapper (no reduction across
        # the megacore-parallel row axis).
        lane = jax.lax.broadcasted_iota(jnp.int32, (TM, LP), 1)
        valid = lane < num_label                      # mask padded label lanes
        ml = jnp.where(valid, logits, -1e30)
        mx = jnp.max(ml, axis=-1, keepdims=True)
        lse = mx + jnp.log(jnp.sum(jnp.exp(ml - mx), axis=-1, keepdims=True))
        onehot = lane == y_ref[...]                   # int32 labels [TM, 1]
        corr = jnp.sum(jnp.where(onehot, logits, 0.0), axis=-1, keepdims=True)
        nll_ref[...] = lse - corr


# --------------------------- packing helpers (glue) ---------------------------

def _round_up(v, m):
    return (v + m - 1) // m * m


def _pick_tile(n, candidates):
    for c in candidates:
        if c <= n and n % c == 0:
            return c
    return n


def _pad2(a, rows, cols):
    out = jnp.zeros((rows, cols), jnp.float32)
    return out.at[: a.shape[0], : a.shape[1]].set(a)


# ---------------------------------- wrapper ----------------------------------

def gated_graph_conv_model(x, A, y, params, *, tm=256, tk=512):
    N = x.shape[0]
    in_dim, H = params["lin_w"].shape
    L = params["cls_w"].shape[1]
    HP = LANE
    LP = LANE
    assert in_dim <= LANE and 3 * H <= LANE and L <= LANE

    # Pad the node dim so it tiles cleanly; pick tiles that divide N_pad.
    N_pad = _round_up(N, LANE)
    TM = _pick_tile(N_pad, (tm, 128))
    TK = _pick_tile(N_pad, (tk, 384, 256, 128))
    row_tiles = N_pad // TM
    k_tiles = N_pad // TK

    # Pack the 15 small tensors into per-stage lane-aligned slabs.
    # Compact gate packing: the (H, 3H) GRU weights keep r|z|n contiguous in
    # lanes 0..3H-1 of a single 128-lane group.
    f32 = jnp.float32
    w_pro = jnp.concatenate([_pad2(params["lin_w"], LANE, HP),
                             _pad2(params["g1_w"], HP, HP)], axis=1)   # [128,256]
    b_pro = _pad2(params["lin_b"], 1, HP)                              # [1,128]
    w_g1 = jnp.concatenate([_pad2(params["g1_wih"], HP, HP),
                            _pad2(params["g1_whh"], HP, HP),
                            _pad2(params["g2_w"], HP, HP)], axis=1)    # [128,384]
    b_g1 = jnp.concatenate([_pad2(params["g1_bih"], 1, HP),
                            _pad2(params["g1_bhh"], 1, HP)], axis=1)   # [1,256]
    w_g2 = jnp.concatenate([_pad2(params["g2_wih"], HP, HP),
                            _pad2(params["g2_whh"], HP, HP),
                            _pad2(params["cls_w"], HP, LP)], axis=1)   # [128,384]
    b_g2 = jnp.concatenate([_pad2(params["g2_bih"], 1, HP),
                            _pad2(params["g2_bhh"], 1, HP),
                            _pad2(params["cls_b"], 1, LP)], axis=1)    # [1,384]

    # Activations / adjacency. A is a 0/1 edge-count matrix -> exact in bf16.
    x_p = _pad2(x, N_pad, LANE)
    A_p = jnp.zeros((N_pad, N_pad), jnp.bfloat16).at[:N, :N].set(
        A.astype(jnp.bfloat16))
    y_p = jnp.zeros((N_pad, 1), jnp.int32).at[:N, 0].set(y.astype(jnp.int32))

    cparams_1d = pltpu.CompilerParams(dimension_semantics=("parallel",))
    cparams_2d = pltpu.CompilerParams(
        dimension_semantics=("parallel", "arbitrary"))
    # NOTE: with TM=256/TK=512 bf16 A tiles, double-buffered VMEM use is ~2 MiB,
    # well inside every chip's default scoped limit.  For bigger tile sweeps on
    # v5e/v6e raise vmem_limit_bytes; do not copy that limit to v7x (64 MiB).

    row_spec = pl.BlockSpec((TM, LANE), lambda i: (i, 0))

    # Stage 0: x = self.linear(x); m1 = x @ W_prop1 ----------------------------
    h0, m1 = pl.pallas_call(
        prologue_kernel,
        out_shape=(jax.ShapeDtypeStruct((N_pad, HP), f32),
                   jax.ShapeDtypeStruct((N_pad, HP), jnp.bfloat16)),
        grid=(row_tiles,),
        in_specs=[row_spec,
                  pl.BlockSpec((LANE, 2 * HP), lambda i: (0, 0)),
                  pl.BlockSpec((1, HP), lambda i: (0, 0))],
        out_specs=(row_spec, row_spec),
        compiler_params=cparams_1d,
    )(x_p, w_pro, b_pro)

    # Shared specs for the tiled (node-row, K) aggregation grid ----------------
    a_spec = pl.BlockSpec((TM, TK), lambda i, k: (i, k))
    m_spec = pl.BlockSpec((TK, HP), lambda i, k: (k, 0))
    h_spec = pl.BlockSpec((TM, HP), lambda i, k: (i, 0))
    y_spec = pl.BlockSpec((TM, 1), lambda i, k: (i, 0))
    out_row = pl.BlockSpec((TM, HP), lambda i, k: (i, 0))
    nll_spec = pl.BlockSpec((TM, 1), lambda i, k: (i, 0))
    acc = pltpu.VMEM((TM, HP), f32)

    # Stage 1: x = self.gat1(x, edge_index); x = F.elu(x)  (+ m2) --------------
    h1, m2 = pl.pallas_call(
        functools.partial(ggc_mid_kernel, hidden=H),
        out_shape=(jax.ShapeDtypeStruct((N_pad, HP), f32),
                   jax.ShapeDtypeStruct((N_pad, HP), jnp.bfloat16)),
        grid=(row_tiles, k_tiles),
        in_specs=[a_spec, m_spec, h_spec,
                  pl.BlockSpec((LANE, 3 * HP), lambda i, k: (0, 0)),
                  pl.BlockSpec((1, 2 * HP), lambda i, k: (0, 0))],
        out_specs=(out_row, out_row),
        scratch_shapes=[acc],
        compiler_params=cparams_2d,
    )(A_p, m1, h0, w_g1, b_g1)

    # Stage 2: x = self.gat2(x, edge_index); classify + per-node CE ------------
    feats_p, logits_p, nll = pl.pallas_call(
        functools.partial(ggc_final_kernel, hidden=H, num_label=L),
        out_shape=(jax.ShapeDtypeStruct((N_pad, HP), f32),
                   jax.ShapeDtypeStruct((N_pad, LP), f32),
                   jax.ShapeDtypeStruct((N_pad, 1), f32)),
        grid=(row_tiles, k_tiles),
        in_specs=[a_spec, m_spec, h_spec, y_spec,
                  pl.BlockSpec((LANE, 3 * HP), lambda i, k: (0, 0)),
                  pl.BlockSpec((1, 3 * HP), lambda i, k: (0, 0))],
        out_specs=(out_row,
                   pl.BlockSpec((TM, LP), lambda i, k: (i, 0)),
                   nll_spec),
        scratch_shapes=[acc],
        compiler_params=cparams_2d,
    )(A_p, m2, h1, y_p, w_g2, b_g2)

    # loss = CrossEntropyLoss()(output, y): mean over the N real nodes.
    loss = jnp.sum(nll[:N, 0]) / N
    return logits_p[:N, :L], loss, feats_p[:N, :H]


# ---------------------------- pure-JAX reference ------------------------------

def reference_forward(x, A, y, p):
    H = p["lin_w"].shape[1]

    def gru(m, h, wih, whh, bih, bhh):
        gi = m @ wih + bih
        gh = h @ whh + bhh
        r = jax.nn.sigmoid(gi[:, :H] + gh[:, :H])
        z = jax.nn.sigmoid(gi[:, H:2 * H] + gh[:, H:2 * H])
        n = jnp.tanh(gi[:, 2 * H:] + r * gh[:, 2 * H:])
        return (1 - z) * n + z * h

    h = x @ p["lin_w"] + p["lin_b"]
    h = gru(A @ (h @ p["g1_w"]), h, p["g1_wih"], p["g1_whh"], p["g1_bih"], p["g1_bhh"])
    h = jnp.where(h > 0, h, jnp.expm1(h))
    h = gru(A @ (h @ p["g2_w"]), h, p["g2_wih"], p["g2_whh"], p["g2_bih"], p["g2_bhh"])
    feats = h
    logits = h @ p["cls_w"] + p["cls_b"]
    logp = jax.nn.log_softmax(logits, axis=-1)
    loss = -jnp.mean(jnp.take_along_axis(logp, y[:, None], axis=1))
    return logits, loss, feats


# ----------------------------------- main -------------------------------------

if __name__ == "__main__":
    # Small, module-consistent shapes.
    N, E = 8, 20            # nodes, edges
    INPUT_DIM = 16
    HIDDEN_DIM = 32
    NUM_LABEL = 6           # matches default label_weight length

    key = jax.random.PRNGKey(0)
    ks = jax.random.split(key, 20)

    def w(k, shape, scale=0.1):
        return (scale * jax.random.normal(k, shape)).astype(jnp.float32)

    params = {
        # nn.Linear(input_dim, hidden_dim): stored pre-transposed [in, out]
        "lin_w": w(ks[0], (INPUT_DIM, HIDDEN_DIM)),
        "lin_b": w(ks[1], (1, HIDDEN_DIM)),
        # GatedGraphConv 1: propagation weight [H, H]; GRUCell weights [H, 3H] (r,z,n)
        "g1_w":   w(ks[2], (HIDDEN_DIM, HIDDEN_DIM)),
        "g1_wih": w(ks[3], (HIDDEN_DIM, 3 * HIDDEN_DIM)),
        "g1_whh": w(ks[4], (HIDDEN_DIM, 3 * HIDDEN_DIM)),
        "g1_bih": w(ks[5], (1, 3 * HIDDEN_DIM)),
        "g1_bhh": w(ks[6], (1, 3 * HIDDEN_DIM)),
        # GatedGraphConv 2
        "g2_w":   w(ks[7], (HIDDEN_DIM, HIDDEN_DIM)),
        "g2_wih": w(ks[8], (HIDDEN_DIM, 3 * HIDDEN_DIM)),
        "g2_whh": w(ks[9], (HIDDEN_DIM, 3 * HIDDEN_DIM)),
        "g2_bih": w(ks[10], (1, 3 * HIDDEN_DIM)),
        "g2_bhh": w(ks[11], (1, 3 * HIDDEN_DIM)),
        # nn.Linear(hidden_dim, num_label): stored pre-transposed [in, out]
        "cls_w": w(ks[12], (HIDDEN_DIM, NUM_LABEL)),
        "cls_b": w(ks[13], (1, NUM_LABEL)),
    }

    # Graph data (data.x, data.edge_index, data.edge_attr, data.y)
    x = jax.random.normal(ks[14], (N, INPUT_DIM), dtype=jnp.float32)
    src = jax.random.randint(ks[15], (E,), 0, N)
    dst = jax.random.randint(ks[16], (E,), 0, N)
    edge_index = jnp.stack([src, dst])                      # [2, E]
    y = jax.random.randint(ks[17], (N,), 0, NUM_LABEL)      # node labels
    # edge_attr exists on the data object but is unused by forward()

    # Glue: dense adjacency for the scatter-add aggregation (A[dst, src] += 1),
    # PyG flow='source_to_target': messages from edge_index[0] sum into edge_index[1].
    A = jnp.zeros((N, N), jnp.float32).at[edge_index[1], edge_index[0]].add(1.0)

    logits, loss, feats = gated_graph_conv_model(x, A, y, params)
    jax.block_until_ready((logits, loss, feats))

    # Sanity-check against a pure-JAX f32 reference.  The kernel streams the
    # aggregation operands (A, m) as bf16 (per the perf review), so tolerances
    # cover the ~0.4% bf16 rounding of m; A itself is exact in bf16.
    r_logits, r_loss, r_feats = reference_forward(x, A, y, params)
    assert jnp.allclose(logits, r_logits, rtol=2e-2, atol=2e-2)
    assert jnp.allclose(feats, r_feats, rtol=2e-2, atol=2e-2)
    assert jnp.allclose(loss, r_loss, rtol=2e-2, atol=2e-2)

    print("KERNEL_OK")
</pallas_src>

<mosaic_0001>
module attributes {stable_mosaic.version = 11 : i64} {
  func.func @prologue_kernel(%arg0: i32, %arg1: memref<128x128xf32, #tpu.memory_space<vmem>>, %arg2: memref<128x256xf32, #tpu.memory_space<vmem>>, %arg3: memref<1x128xf32, #tpu.memory_space<vmem>>, %arg4: memref<128x128xf32, #tpu.memory_space<vmem>>, %arg5: memref<128x128xbf16, #tpu.memory_space<vmem>>) attributes {dimension_semantics = [#tpu.dimension_semantics<parallel>], iteration_bounds = array<i64: 1>, scalar_prefetch = 0 : i64, scratch_operands = 0 : i64, tpu.core_type = #tpu.core_type<tc>, window_params = [{transform_indices = @transform_0, window_bounds = array<i64: 128, 128>}, {pipeline_mode = #tpu.pipeline_mode<synchronous>, transform_indices = @transform_1, window_bounds = array<i64: 128, 256>}, {pipeline_mode = #tpu.pipeline_mode<synchronous>, transform_indices = @transform_2, window_bounds = array<i64: 1, 128>}, {transform_indices = @transform_3, window_bounds = array<i64: 128, 128>}, {transform_indices = @transform_4, window_bounds = array<i64: 128, 128>}]} {
    %c0 = arith.constant 0 : index
    %c0_0 = arith.constant 0 : index
    %0 = vector.load %arg1[%c0, %c0_0] : memref<128x128xf32, #tpu.memory_space<vmem>>, vector<128x128xf32>
    %c0_1 = arith.constant 0 : index
    %c0_2 = arith.constant 0 : index
    %1 = vector.load %arg2[%c0_1, %c0_2] : memref<128x256xf32, #tpu.memory_space<vmem>>, vector<128x128xf32>
    %cst = arith.constant dense<0.000000e+00> : vector<128x128xf32>
    %2 = tpu.matmul %0, %1, %cst {dimension_numbers = #tpu.dot_dimension_numbers<[1], [0], [0], [1], [0, 0, 1, 1], [], []>} : vector<128x128xf32>, vector<128x128xf32>, vector<128x128xf32> -> vector<128x128xf32>
    %c0_3 = arith.constant 0 : index
    %c0_4 = arith.constant 0 : index
    %3 = vector.load %arg3[%c0_3, %c0_4] : memref<1x128xf32, #tpu.memory_space<vmem>>, vector<1x128xf32>
    %4 = vector.broadcast %3 : vector<1x128xf32> to vector<128x128xf32>
    %5 = arith.addf %2, %4 : vector<128x128xf32>
    %c0_5 = arith.constant 0 : index
    %c0_6 = arith.constant 0 : index
    %6 = vector.load %arg4[%c0_5, %c0_6] : memref<128x128xf32, #tpu.memory_space<vmem>>, vector<128x128xf32>
    tpu.vector_store %arg4[%c0_5, %c0_6], %5 {strides = array<i32>} : memref<128x128xf32, #tpu.memory_space<vmem>>, vector<128x128xf32>,
    %c0_7 = arith.constant 0 : index
    %c128 = arith.constant 128 : index
    %7 = vector.load %arg2[%c0_7, %c128] : memref<128x256xf32, #tpu.memory_space<vmem>>, vector<128x128xf32>
    %cst_8 = arith.constant dense<0.000000e+00> : vector<128x128xf32>
    %8 = tpu.matmul %5, %7, %cst_8 {dimension_numbers = #tpu.dot_dimension_numbers<[1], [0], [0], [1], [0, 0, 1, 1], [], []>} : vector<128x128xf32>, vector<128x128xf32>, vector<128x128xf32> -> vector<128x128xf32>
    %9 = arith.truncf %8 : vector<128x128xf32> to vector<128x128xbf16>
    %c0_9 = arith.constant 0 : index
    %c0_10 = arith.constant 0 : index
    %10 = vector.load %arg5[%c0_9, %c0_10] : memref<128x128xbf16, #tpu.memory_space<vmem>>, vector<128x128xbf16>
    tpu.vector_store %arg5[%c0_9, %c0_10], %9 {strides = array<i32>} : memref<128x128xbf16, #tpu.memory_space<vmem>>, vector<128x128xbf16>,
    return
  }
  func.func @transform_0(%arg0: i32) -> (i32, i32) {
    %c0_i32 = arith.constant 0 : i32
    %c0_i32_0 = arith.constant 0 : i32
    return %arg0, %c0_i32 : i32, i32
  }
  func.func @transform_1(%arg0: i32) -> (i32, i32) {
    %c0_i32 = arith.constant 0 : i32
    %c0_i32_0 = arith.constant 0 : i32
    %c0_i32_1 = arith.constant 0 : i32
    return %c0_i32, %c0_i32_0 : i32, i32
  }
  func.func @transform_2(%arg0: i32) -> (i32, i32) {
    %c0_i32 = arith.constant 0 : i32
    %c0_i32_0 = arith.constant 0 : i32
    %c0_i32_1 = arith.constant 0 : i32
    return %c0_i32, %c0_i32_0 : i32, i32
  }
  func.func @transform_3(%arg0: i32) -> (i32, i32) {
    %c0_i32 = arith.constant 0 : i32
    %c0_i32_0 = arith.constant 0 : i32
    return %arg0, %c0_i32 : i32, i32
  }
  func.func @transform_4(%arg0: i32) -> (i32, i32) {
    %c0_i32 = arith.constant 0 : i32
    %c0_i32_0 = arith.constant 0 : i32
    return %arg0, %c0_i32 : i32, i32
  }
}

</mosaic_0001>

<bundles_post_ra>
// kernel: tpu_custom_call.1
= control target key start
LH: loop header
LB: loop body
LE: loop exit
PB: predicated region body
PF: predicated region fallthrough
CT: control target
= control target key end

     0   :  { %10 = vsyncpa [#allocation3], 0  ;;  %s568_s0 = inlined_call_operand.hbm [shape: f32[128,128], index: 0, kind: input, shape index: {}]   ;;  %s569_s1 = inlined_call_operand.hbm [shape: f32[128,256], index: 1, kind: input, shape index: {}]   ;;  %s570_s2 = inlined_call_operand.vmem [shape: f32[1,128], index: 2, kind: input, shape index: {}]   ;;  %s571_s3 = inlined_call_operand.hbm [shape: f32[128,128], index: 3, kind: output, shape index: {0}]   ;;  %s572_s4 = inlined_call_operand.hbm [shape: bf16[128,128], index: 4, kind: output, shape index: {1}]  }
   0x1   :  { %11 = vsyncpa [#allocation6], 0 }
   0x2   :  { %12 = vsyncpa [#allocation4], 0 }
   0x3   :  { %13 = vsyncpa [#allocation9], 0  ;;  %s18_s17 = sshll.u32 %s568_s0, 4  ;;  %s512_s18 = smov [#allocation2]   ;;  %s19_s17 = int_to_ptr.hbm [resolvable:$true] %s18_s17 }
   0x4   :  { %s20_s19 = sshll.u32 %s512_s18, 4  ;;  %s31_s22 = sshll.u32 %s569_s1, 4  ;;  %s21_s19 = int_to_ptr.vmem [resolvable:$true] %s20_s19  ;;  %s32_s22 = int_to_ptr.hbm [resolvable:$true] %s31_s22 }
   0x5   :  { %s513_s23 = smov 128   ;;  %s514_s24 = smov 8  }
   0x6   :  { %26 = dma.hbm_to_vmem [thread:$0]  %s19_s17, 2048, %s21_s19, [#allocation3], %s513_s23, %s513_s23, %s514_s24  }
   0x7   :  { %s515_s25 = smov [#allocation5]   ;;  %s516_s27 = smov 256  }
   0x8   :  { %s33_s26 = sshll.u32 %s515_s25, 4  ;;  %s517_s0 = smov 16   ;;  %s34_s26 = int_to_ptr.vmem [resolvable:$true] %s33_s26 }
   0x9   :  { %39 = dma.hbm_to_vmem [thread:$0]  %s32_s22, 4096, %s34_s26, [#allocation6], %s516_s27, %s516_s27, %s517_s0  }
   0xa   :  { %504 = dma.done.wait [#allocation3], 2048  }
   0xb   :  { %505 = vsyncadd [#allocation3], 4294965248 }
   0xc   :  { %506 = dma.done.wait [#allocation6], 4096  }
   0xd   :  { %507 = vsyncadd [#allocation6], 4294963200  ;;  %v81_v0 = vld [vmem:[#allocation5 + $0xf0] sm:$0xff]  ;;  %v80_v1 = vld [vmem:[#allocation5 + $0xe0] sm:$0xff]  ;;  %s286_s6 = sshll.u32 %s571_s3, 4  ;;  %s519_s3 = smov [#allocation8]   ;;  %s287_s6 = int_to_ptr.hbm [resolvable:$true] %s286_s6 }
   0xe   :  { %365 = vmatpush.msra.mxu2 %v81_v0  ;;  %86 = vmatpush.msra.mxu0 %v81_v0  ;;  %v79_v2 = vld [vmem:[#allocation5 + $0xd0] sm:$0xff]  ;;  %v78_v3 = vld [vmem:[#allocation5 + $0xc0] sm:$0xff]  ;;  %v59_v18 = vld [vmem:[#allocation2 + $0x48] sm:$0xff]  ;;  %s297_s7 = sshll.u32 %s519_s3, 4  ;;  %s299_s10 = sshll.u32 %s572_s4, 4  ;;  %s298_s7 = int_to_ptr.vmem [resolvable:$true] %s297_s7  ;;  %s300_s10 = int_to_ptr.hbm [resolvable:$true] %s299_s10 }
   0xf   :  { %v77_v4 = vld [vmem:[#allocation5 + $0xb0] sm:$0xff]  ;;  %v76_v5 = vld [vmem:[#allocation5 + $0xa0] sm:$0xff]  ;;  %v51_v19 = vld [vmem:[#allocation2 + $0x8] sm:$0xff]  ;;  %s520_s11 = smov 64   ;;  %s521_s12 = smov 4  }
  0x10   :  { %366 = vmatpush.msra.mxu2 %v80_v1  ;;  %87 = vmatpush.msra.mxu0 %v80_v1  ;;  %v75_v6 = vld [vmem:[#allocation5 + $0x90] sm:$0xff]  ;;  %v74_v7 = vld [vmem:[#allocation5 + $0x80] sm:$0xff]  ;;  %v61_v22 = vld [vmem:[#allocation2 + $0x58] sm:$0xff] }
  0x11   :  { %v73_v8 = vld [vmem:[#allocation5 + $0x70] sm:$0xff]  ;;  %v72_v9 = vld [vmem:[#allocation5 + $0x60] sm:$0xff]  ;;  %v53_v23 = vld [vmem:[#allocation2 + $0x18] sm:$0xff] }
  0x12   :  { %367 = vmatpush.msra.mxu2 %v79_v2  ;;  %88 = vmatpush.msra.mxu0 %v79_v2  ;;  %v71_v10 = vld [vmem:[#allocation5 + $0x50] sm:$0xff]  ;;  %v70_v11 = vld [vmem:[#allocation5 + $0x40] sm:$0xff]  ;;  %v182_v24 = vld [vmem:[#allocation5 + $0xf8] sm:$0xff] }
  0x13   :  { %v69_v12 = vld [vmem:[#allocation5 + $0x30] sm:$0xff]  ;;  %v68_v13 = vld [vmem:[#allocation5 + $0x20] sm:$0xff]  ;;  %v181_v25 = vld [vmem:[#allocation5 + $0xe8] sm:$0xff]  ;;  %183 = vmatpush.msra.mxu1 %v182_v24  ;;  %381 = vmatpush.msra.mxu3 %v182_v24 }
  0x14   :  { %368 = vmatpush.msra.mxu2 %v78_v3  ;;  %89 = vmatpush.msra.mxu0 %v78_v3  ;;  %v67_v14 = vld [vmem:[#allocation5 + $0x10] sm:$0xff]  ;;  %v66_v15 = vld [vmem:[#allocation5] sm:$0xff]  ;;  %v180_v26 = vld [vmem:[#allocation5 + $0xd8] sm:$0xff] }
  0x15   :  { %v58_v16 = vld [vmem:[#allocation2 + $0x40] sm:$0xff]  ;;  %v60_v20 = vld [vmem:[#allocation2 + $0x50] sm:$0xff]  ;;  %184 = vmatpush.msra.mxu1 %v181_v25  ;;  %382 = vmatpush.msra.mxu3 %v181_v25  ;;  %v179_v27 = vld [vmem:[#allocation5 + $0xc8] sm:$0xff] }
  0x16   :  { %369 = vmatpush.msra.mxu2 %v77_v4  ;;  %90 = vmatpush.msra.mxu0 %v77_v4  ;;  %v50_v17 = vld [vmem:[#allocation2] sm:$0xff]  ;;  %v52_v21 = vld [vmem:[#allocation2 + $0x10] sm:$0xff]  ;;  %v178_v30 = vld [vmem:[#allocation5 + $0xb8] sm:$0xff] }
  0x17   :  { %v62_v28 = vld [vmem:[#allocation2 + $0x60] sm:$0xff]  ;;  %185 = vmatpush.msra.mxu1 %v180_v26  ;;  %383 = vmatpush.msra.mxu3 %v180_v26  ;;  %v177_v31 = vld [vmem:[#allocation5 + $0xa8] sm:$0xff]  ;;  %v176_v32 = vld [vmem:[#allocation5 + $0x98] sm:$0xff] }
  0x18   :  { %370 = vmatpush.msra.mxu2 %v76_v5  ;;  %91 = vmatpush.msra.mxu0 %v76_v5  ;;  %v54_v29 = vld [vmem:[#allocation2 + $0x20] sm:$0xff]  ;;  %v175_v33 = vld [vmem:[#allocation5 + $0x88] sm:$0xff]  ;;  %v174_v36 = vld [vmem:[#allocation5 + $0x78] sm:$0xff] }
  0x19   :  { %186 = vmatpush.msra.mxu1 %v179_v27  ;;  %384 = vmatpush.msra.mxu3 %v179_v27  ;;  %v63_v34 = vld [vmem:[#allocation2 + $0x68] sm:$0xff]  ;;  %v172_v38 = vld [vmem:[#allocation5 + $0x58] sm:$0xff]  ;;  %v64_v40 = vld [vmem:[#allocation2 + $0x70] sm:$0xff] }
  0x1a   :  { %371 = vmatpush.msra.mxu2 %v75_v6  ;;  %92 = vmatpush.msra.mxu0 %v75_v6  ;;  %v55_v35 = vld [vmem:[#allocation2 + $0x28] sm:$0xff]  ;;  %v56_v41 = vld [vmem:[#allocation2 + $0x30] sm:$0xff]  ;;  %v170_v42 = vld [vmem:[#allocation5 + $0x38] sm:$0xff] }
  0x1b   :  { %187 = vmatpush.msra.mxu1 %v178_v30  ;;  %385 = vmatpush.msra.mxu3 %v178_v30  ;;  %v173_v37 = vld [vmem:[#allocation5 + $0x68] sm:$0xff]  ;;  %v65_v44 = vld [vmem:[#allocation2 + $0x78] sm:$0xff]  ;;  %v407_v48 = vld [vmem:[%s570_s2] ss:$0 sm:$0xff]  ;;  %s518_s2 = smov [#allocation7]  }
  0x1c   :  { %372 = vmatpush.msra.mxu2 %v74_v7  ;;  %93 = vmatpush.msra.mxu0 %v74_v7  ;;  %v171_v39 = vld [vmem:[#allocation5 + $0x48] sm:$0xff]  ;;  %v57_v45 = vld [vmem:[#allocation2 + $0x38] sm:$0xff]  ;;  %s284_s29 = sshll.u32 %s518_s2, 4  ;;  %s285_s29 = int_to_ptr.vmem [resolvable:$true] %s284_s29 }
  0x1d   :  { %188 = vmatpush.msra.mxu1 %v177_v31  ;;  %386 = vmatpush.msra.mxu3 %v177_v31  ;;  %v169_v43 = vld [vmem:[#allocation5 + $0x28] sm:$0xff]  ;;  %v168_v46 = vld [vmem:[#allocation5 + $0x18] sm:$0xff] }
  0x1e   :  { %373 = vmatpush.msra.mxu2 %v73_v8  ;;  %94 = vmatpush.msra.mxu0 %v73_v8  ;;  %v167_v47 = vld [vmem:[#allocation5 + $0x8] sm:$0xff] }
  0x1f   :  { %189 = vmatpush.msra.mxu1 %v176_v32  ;;  %387 = vmatpush.msra.mxu3 %v176_v32 }
  0x20   :  { %374 = vmatpush.msra.mxu2 %v72_v9  ;;  %95 = vmatpush.msra.mxu0 %v72_v9 }
  0x21   :  { %190 = vmatpush.msra.mxu1 %v175_v33  ;;  %388 = vmatpush.msra.mxu3 %v175_v33 }
  0x22   :  { %375 = vmatpush.msra.mxu2 %v71_v10  ;;  %96 = vmatpush.msra.mxu0 %v71_v10 }
  0x23   :  { %191 = vmatpush.msra.mxu1 %v174_v36  ;;  %389 = vmatpush.msra.mxu3 %v174_v36 }
  0x24   :  { %376 = vmatpush.msra.mxu2 %v70_v11  ;;  %97 = vmatpush.msra.mxu0 %v70_v11 }
  0x25   :  { %192 = vmatpush.msra.mxu1 %v173_v37  ;;  %390 = vmatpush.msra.mxu3 %v173_v37 }
  0x26   :  { %377 = vmatpush.msra.mxu2 %v69_v12  ;;  %98 = vmatpush.msra.mxu0 %v69_v12 }
  0x27   :  { %193 = vmatpush.msra.mxu1 %v172_v38  ;;  %391 = vmatpush.msra.mxu3 %v172_v38 }
  0x28   :  { %378 = vmatpush.msra.mxu2 %v68_v13  ;;  %99 = vmatpush.msra.mxu0 %v68_v13 }
  0x29   :  { %194 = vmatpush.msra.mxu1 %v171_v39  ;;  %392 = vmatpush.msra.mxu3 %v171_v39 }
  0x2a   :  { %379 = vmatpush.msra.mxu2 %v67_v14  ;;  %100 = vmatpush.msra.mxu0 %v67_v14 }
  0x2b   :  { %195 = vmatpush.msra.mxu1 %v170_v42  ;;  %393 = vmatpush.msra.mxu3 %v170_v42 }
  0x2c   :  { %380 = vmatpush.msra.mxu2 %v66_v15  ;;  %101 = vmatpush.msra.mxu0 %v66_v15 }
  0x2d   :  { %126 = vmatmul.f32.vlgmr.msra.gmra.mxu2 %v58_v16  ;;  %102 = vmatmul.f32.vlgmr.msra.gmra.mxu0 %v50_v17 }
  0x2e   :  { %196 = vmatpush.msra.mxu1 %v169_v43  ;;  %394 = vmatpush.msra.mxu3 %v169_v43 }
  0x30   :  { %197 = vmatpush.msra.mxu1 %v168_v46  ;;  %395 = vmatpush.msra.mxu3 %v168_v46 }
  0x32   :  { %198 = vmatpush.msra.mxu1 %v167_v47  ;;  %396 = vmatpush.msra.mxu3 %v167_v47 }
  0x35   :  { %129 = vmatmul.f32.gmra.mxu2 %v59_v18  ;;  %105 = vmatmul.f32.gmra.mxu0 %v51_v19 }
  0x3d   :  { %132 = vmatmul.f32.gmra.mxu2 %v60_v20  ;;  %108 = vmatmul.f32.gmra.mxu0 %v52_v21 }
  0x45   :  { %135 = vmatmul.f32.gmra.mxu2 %v61_v22  ;;  %111 = vmatmul.f32.gmra.mxu0 %v53_v23 }
  0x4d   :  { %138 = vmatmul.f32.gmra.mxu2 %v62_v28  ;;  %114 = vmatmul.f32.gmra.mxu0 %v54_v29 }
  0x55   :  { %141 = vmatmul.f32.gmra.mxu2 %v63_v34  ;;  %117 = vmatmul.f32.gmra.mxu0 %v55_v35 }
  0x5d   :  { %144 = vmatmul.f32.gmra.mxu2 %v64_v40  ;;  %120 = vmatmul.f32.gmra.mxu0 %v56_v41 }
  0x65   :  { %147 = vmatmul.f32.gmra.mxu2 %v65_v44  ;;  %123 = vmatmul.f32.gmra.mxu0 %v57_v45 }
  0xaa   :  { %v103_v49 = vpop.f32.mrf.mxu0 }
  0xab   :  { %v104_v50 = vadd.f32 %v407_v48, %v103_v49 }
  0xad   :  { %151 = vst [vmem:[#allocation7] sm:$0xff] %v104_v50  ;;  %199 = vmatmul.f32.vlgmr.msra.gmra.mxu1 %v104_v50 }
  0xb0   :  { %v127_v51 = vpop.f32.mrf.mxu2 }
  0xb1   :  { %v128_v52 = vadd.f32 %v407_v48, %v127_v51 }
  0xb2   :  { %v106_v53 = vpop.f32.mrf.mxu0 }
  0xb3   :  { %159 = vst [vmem:[#allocation7 + $0x40] sm:$0xff] %v128_v52  ;;  %223 = vmatmul.f32.vlgmr.msra.gmra.mxu3 %v128_v52  ;;  %v107_v54 = vadd.f32 %v407_v48, %v106_v53 }
  0xb5   :  { %152 = vst [vmem:[#allocation7 + $0x8] sm:$0xff] %v107_v54  ;;  %202 = vmatmul.f32.gmra.mxu1 %v107_v54 }
  0xb8   :  { %v130_v55 = vpop.f32.mrf.mxu2 }
  0xb9   :  { %v131_v56 = vadd.f32 %v407_v48, %v130_v55 }
  0xba   :  { %v109_v57 = vpop.f32.mrf.mxu0 }
  0xbb   :  { %160 = vst [vmem:[#allocation7 + $0x48] sm:$0xff] %v131_v56  ;;  %226 = vmatmul.f32.gmra.mxu3 %v131_v56  ;;  %v110_v58 = vadd.f32 %v407_v48, %v109_v57 }
  0xbd   :  { %153 = vst [vmem:[#allocation7 + $0x10] sm:$0xff] %v110_v58  ;;  %205 = vmatmul.f32.gmra.mxu1 %v110_v58 }
  0xc0   :  { %v133_v59 = vpop.f32.mrf.mxu2 }
  0xc1   :  { %v134_v60 = vadd.f32 %v407_v48, %v133_v59 }
  0xc2   :  { %v112_v61 = vpop.f32.mrf.mxu0 }
  0xc3   :  { %161 = vst [vmem:[#allocation7 + $0x50] sm:$0xff] %v134_v60  ;;  %229 = vmatmul.f32.gmra.mxu3 %v134_v60  ;;  %v113_v62 = vadd.f32 %v407_v48, %v112_v61 }
  0xc5   :  { %154 = vst [vmem:[#allocation7 + $0x18] sm:$0xff] %v113_v62  ;;  %208 = vmatmul.f32.gmra.mxu1 %v113_v62 }
  0xc8   :  { %v136_v63 = vpop.f32.mrf.mxu2 }
  0xc9   :  { %v137_v0 = vadd.f32 %v407_v48, %v136_v63 }
  0xca   :  { %v115_v1 = vpop.f32.mrf.mxu0 }
  0xcb   :  { %162 = vst [vmem:[#allocation7 + $0x58] sm:$0xff] %v137_v0  ;;  %232 = vmatmul.f32.gmra.mxu3 %v137_v0  ;;  %v116_v2 = vadd.f32 %v407_v48, %v115_v1 }
  0xcd   :  { %155 = vst [vmem:[#allocation7 + $0x20] sm:$0xff] %v116_v2  ;;  %211 = vmatmul.f32.gmra.mxu1 %v116_v2 }
  0xd0   :  { %v139_v3 = vpop.f32.mrf.mxu2 }
  0xd1   :  { %v140_v4 = vadd.f32 %v407_v48, %v139_v3 }
  0xd2   :  { %v118_v5 = vpop.f32.mrf.mxu0 }
  0xd3   :  { %163 = vst [vmem:[#allocation7 + $0x60] sm:$0xff] %v140_v4  ;;  %235 = vmatmul.f32.gmra.mxu3 %v140_v4  ;;  %v119_v6 = vadd.f32 %v407_v48, %v118_v5 }
  0xd5   :  { %156 = vst [vmem:[#allocation7 + $0x28] sm:$0xff] %v119_v6  ;;  %214 = vmatmul.f32.gmra.mxu1 %v119_v6 }
  0xd8   :  { %v142_v7 = vpop.f32.mrf.mxu2 }
  0xd9   :  { %v143_v8 = vadd.f32 %v407_v48, %v142_v7 }
  0xda   :  { %v121_v9 = vpop.f32.mrf.mxu0 }
  0xdb   :  { %164 = vst [vmem:[#allocation7 + $0x68] sm:$0xff] %v143_v8  ;;  %238 = vmatmul.f32.gmra.mxu3 %v143_v8  ;;  %v122_v10 = vadd.f32 %v407_v48, %v121_v9 }
  0xdd   :  { %157 = vst [vmem:[#allocation7 + $0x30] sm:$0xff] %v122_v10  ;;  %217 = vmatmul.f32.gmra.mxu1 %v122_v10 }
  0xe0   :  { %v145_v11 = vpop.f32.mrf.mxu2 }
  0xe1   :  { %v146_v12 = vadd.f32 %v407_v48, %v145_v11 }
  0xe2   :  { %v124_v13 = vpop.f32.mrf.mxu0 }
  0xe3   :  { %165 = vst [vmem:[#allocation7 + $0x70] sm:$0xff] %v146_v12  ;;  %241 = vmatmul.f32.gmra.mxu3 %v146_v12  ;;  %v125_v14 = vadd.f32 %v407_v48, %v124_v13 }
  0xe5   :  { %158 = vst [vmem:[#allocation7 + $0x38] sm:$0xff] %v125_v14  ;;  %220 = vmatmul.f32.gmra.mxu1 %v125_v14 }
  0xe8   :  { %v148_v15 = vpop.f32.mrf.mxu2 }
  0xe9   :  { %v149_v16 = vadd.f32 %v407_v48, %v148_v15 }
  0xeb   :  { %166 = vst [vmem:[#allocation7 + $0x78] sm:$0xff] %v149_v16  ;;  %244 = vmatmul.f32.gmra.mxu3 %v149_v16 }
  0xec   :  { %292 = dma.vmem_to_hbm [thread:$0]  %s285_s29, 2048, %s287_s6, [#allocation4], %s513_s23, %s513_s23, %s514_s24  }
 0x12a   :  { %v200_v17 = vpop.f32.mrf.mxu1 }
 0x132   :  { %v203_v18 = vpop.f32.mrf.mxu1 }
 0x133   :  { %v321_v19 = vpack.c.bf16 %v203_v18, %v200_v17 }
 0x135   :  { %322 = vst [vmem:[#allocation8] sm:$0xff] %v321_v19  }
 0x136   :  { %v224_v20 = vpop.f32.mrf.mxu3 }
 0x13a   :  { %v206_v21 = vpop.f32.mrf.mxu1 }
 0x13e   :  { %v227_v22 = vpop.f32.mrf.mxu3 }
 0x13f   :  { %v341_v23 = vpack.c.bf16 %v227_v22, %v224_v20 }
 0x141   :  { %361 = vst [vmem:[#allocation8 + $0x20] sm:$0xff] %v341_v23  }
 0x142   :  { %v209_v24 = vpop.f32.mrf.mxu1 }
 0x143   :  { %v326_v25 = vpack.c.bf16 %v209_v24, %v206_v21 }
 0x145   :  { %358 = vst [vmem:[#allocation8 + $0x8] sm:$0xff] %v326_v25  }
 0x146   :  { %v230_v26 = vpop.f32.mrf.mxu3 }
 0x14a   :  { %v212_v27 = vpop.f32.mrf.mxu1 }
 0x14e   :  { %v233_v28 = vpop.f32.mrf.mxu3 }
 0x14f   :  { %v346_v29 = vpack.c.bf16 %v233_v28, %v230_v26 }
 0x151   :  { %362 = vst [vmem:[#allocation8 + $0x28] sm:$0xff] %v346_v29  }
 0x152   :  { %v215_v30 = vpop.f32.mrf.mxu1 }
 0x153   :  { %v331_v31 = vpack.c.bf16 %v215_v30, %v212_v27 }
 0x155   :  { %359 = vst [vmem:[#allocation8 + $0x10] sm:$0xff] %v331_v31  }
 0x156   :  { %v236_v32 = vpop.f32.mrf.mxu3 }
 0x15a   :  { %v218_v33 = vpop.f32.mrf.mxu1 }
 0x15e   :  { %v239_v34 = vpop.f32.mrf.mxu3 }
 0x15f   :  { %v351_v35 = vpack.c.bf16 %v239_v34, %v236_v32 }
 0x161   :  { %363 = vst [vmem:[#allocation8 + $0x30] sm:$0xff] %v351_v35  }
 0x162   :  { %v221_v36 = vpop.f32.mrf.mxu1 }
 0x163   :  { %v336_v37 = vpack.c.bf16 %v221_v36, %v218_v33 }
 0x165   :  { %360 = vst [vmem:[#allocation8 + $0x18] sm:$0xff] %v336_v37  }
 0x166   :  { %v242_v38 = vpop.f32.mrf.mxu3 }
 0x16e   :  { %v245_v39 = vpop.f32.mrf.mxu3 }
 0x16f   :  { %v356_v40 = vpack.c.bf16 %v245_v39, %v242_v38 }
 0x171   :  { %364 = vst [vmem:[#allocation8 + $0x38] sm:$0xff] %v356_v40  }
 0x172   :  { %305 = dma.vmem_to_hbm [thread:$0]  %s298_s7, 1024, %s300_s10, [#allocation9], %s520_s11, %s520_s11, %s521_s12  }
 0x173   :  { %508 = dma.done.wait [#allocation4], 2048  }
 0x174   :  { %509 = vsyncadd [#allocation4], 4294965248 }
 0x175   :  { %510 = dma.done.wait [#allocation9], 1024  }
 0x176   :  { %511 = vsyncadd [#allocation9], 4294966272 }
 0x177   :  { %314 = vsyncpa [#allocation3], 1 }
 0x178   :  { %315 = vsyncpa [#allocation6], 1 }
 0x179   :  { %316 = vsyncpa [#allocation4], 1 }
 0x17a   :  { %317 = vsyncpa [#allocation9], 1 }

</bundles_post_ra>
